<compile_context>
chip_gen: v7x
topology: tpu7x:2x2x1
jax: 0.10.0
libtpu: 0.0.40
codegen_flags: <defaults>
</compile_context>

<pallas_src>
import jax
import jax.numpy as jnp
from jax import lax
from jax.experimental import pallas as pl
from jax.experimental.pallas import tpu as pltpu

BN_EPS = 1e-5


def _pool_bn_kernel(xp_ref, g_ref, b_ref, out_ref):
    """xp_ref: (d_pool, N, Ct, Lo)   g_ref/b_ref: (3, Ct, 1)   out_ref: (N, 3, Ct, Lo)."""
    d = xp_ref.shape[0]

    # --- pooling: elementwise combine of the d_pool window phases (pure VPU) ---
    x0 = xp_ref[0].astype(jnp.float32)            # (N, Ct, Lo), Lo on lanes
    acc, vmax, vmin = x0, x0, x0
    for p in range(1, d):
        xi = xp_ref[p].astype(jnp.float32)
        acc = acc + xi
        vmax = jnp.maximum(vmax, xi)
        vmin = jnp.minimum(vmin, xi)
    pools = (acc * (1.0 / d), vmax, vmin)          # avg, max, min

    n, _, lo = x0.shape
    inv_count = 1.0 / (n * lo)

    for i, v in enumerate(pools):
        # single-pass batch stats (per channel, over N and Lo); stats are tiny.
        # NOTE: E[x^2]-E[x]^2 is used for speed; fine for BN-scale data (post-pool,
        # roughly centered).  Keep f32 accumulation.
        s = jnp.sum(v, axis=(0, 2), keepdims=True)         # (1, Ct, 1)
        s2 = jnp.sum(v * v, axis=(0, 2), keepdims=True)    # (1, Ct, 1)
        mu = s * inv_count
        var = s2 * inv_count - mu * mu

        g = g_ref[i][None]                                  # (1, Ct, 1)
        b = b_ref[i][None]
        scale = g * lax.rsqrt(var + BN_EPS)                  # fold BN: 2 VPU ops/elem
        bias = b - mu * scale
        out_ref[:, i] = (v * scale + bias).astype(out_ref.dtype)


def _pick_channel_tile(N, C, Lo, d_pool, budget_bytes=12 << 20):
    """Largest channel tile (multiple of 8 dividing C, or C itself) fitting the VMEM budget."""
    # double-buffered input (d_pool phases) + output (3 pools), f32
    bytes_per_channel = 2 * (d_pool + 3) * N * Lo * 4
    ct = min(C, max(1, budget_bytes // max(bytes_per_channel, 1)))
    if ct >= C:
        return C
    ct = (ct // 8) * 8
    while ct >= 8 and C % ct:
        ct -= 8
    # fall back to whole-C block if no clean multiple-of-8 divisor fits the budget
    return ct if (ct >= 8 and C % ct == 0) else C


def pool_path_forward(x, gammas, betas, d_pool=3, s_pool=3):
    """x: (N, C, L) float32.  gammas/betas: (3, C) -> [bn_avg, bn_max, bn_min]."""
    # extractor(X): injected submodule in the original module; identity here.
    # TODO(synk): only s_pool == d_pool (the module defaults) is supported; a general
    #             stride would need overlapping-window gathers.
    assert s_pool == d_pool, "only non-overlapping pooling (module defaults) supported"
    N, C, L = x.shape
    Lo = (L - d_pool) // s_pool + 1
    Lw = Lo * d_pool

    # Lane-dense layout plumbing: (N,C,Lw) -> (N,C,Lo,d) is a free reshape; the
    # moveaxis is the single input-side shuffle, traded for a pure-VPU kernel body
    # with Lo on the 128-lane axis.
    xp = jnp.moveaxis(x[..., :Lw].reshape(N, C, Lo, d_pool), -1, 0)  # (d, N, C, Lo)
    g = gammas.astype(jnp.float32).reshape(3, C, 1)
    b = betas.astype(jnp.float32).reshape(3, C, 1)

    Ct = _pick_channel_tile(N, C, Lo, d_pool)
    grid = (C // Ct,)

    out4 = pl.pallas_call(
        _pool_bn_kernel,
        out_shape=jax.ShapeDtypeStruct((N, 3, C, Lo), jnp.float32),
        grid=grid,
        in_specs=[
            pl.BlockSpec((d_pool, N, Ct, Lo), lambda c: (0, 0, c, 0)),
            pl.BlockSpec((3, Ct, 1), lambda c: (0, c, 0)),
            pl.BlockSpec((3, Ct, 1), lambda c: (0, c, 0)),
        ],
        out_specs=pl.BlockSpec((N, 3, Ct, Lo), lambda c: (0, 0, c, 0)),
        compiler_params=pltpu.CompilerParams(
            dimension_semantics=("parallel",),      # shard channel tiles across TCs (v7x)
            vmem_limit_bytes=32 * 1024 * 1024,      # safe on v5e/v6e/v7x; tiles budgeted below it
        ),
    )(xp, g, b)

    # (N, 3, C, Lo) -> (N, 3C, Lo): merges adjacent dims -> bitcast reshape (no extra
    # HBM pass); channel order matches torch.cat([avg, max, min], dim=1).
    return out4.reshape(N, 3 * C, Lo)


def pool_path_reference(x, gammas, betas, d_pool=3, s_pool=3):
    """Pure-JAX reference mirroring the PyTorch forward (train-mode BN, two-pass var)."""
    N, C, L = x.shape
    Lo = (L - d_pool) // s_pool + 1
    xw = x[..., : Lo * d_pool].reshape(N, C, Lo, d_pool)
    pools = [jnp.mean(xw, -1), jnp.max(xw, -1), jnp.min(xw, -1)]
    outs = []
    for i, v in enumerate(pools):
        mu = jnp.mean(v, axis=(0, 2), keepdims=True)
        var = jnp.mean((v - mu) ** 2, axis=(0, 2), keepdims=True)
        y = (v - mu) * lax.rsqrt(var + BN_EPS)
        y = y * gammas[i][None, :, None] + betas[i][None, :, None]
        outs.append(y)
    return jnp.concatenate(outs, axis=1)


if __name__ == "__main__":
    key = jax.random.PRNGKey(0)
    kx, kg, kb = jax.random.split(key, 3)

    # small shapes consistent with the module; L chosen so Lo = 128 (one full lane row)
    N, C, L = 2, 8, 384
    X = jax.random.normal(kx, (N, C, L), dtype=jnp.float32)
    gammas = 1.0 + 0.1 * jax.random.normal(kg, (3, C), dtype=jnp.float32)
    betas = 0.1 * jax.random.normal(kb, (3, C), dtype=jnp.float32)

    out = pool_path_forward(X, gammas, betas)
    out = jax.block_until_ready(out)

    ref = pool_path_reference(X, gammas, betas)
    Lo = (L - 3) // 3 + 1
    assert out.shape == (N, 3 * C, Lo), out.shape
    # kernel uses single-pass E[x^2]-E[x]^2 variance; reference uses two-pass centered
    assert jnp.allclose(out, ref, rtol=1e-4, atol=1e-4), "mismatch vs pure-JAX reference"

    print("KERNEL_OK")
</pallas_src>

<mosaic_0001>
module attributes {stable_mosaic.version = 11 : i64} {
  func.func @_pool_bn_kernel(%arg0: i32, %arg1: memref<3x2x8x128xf32, #tpu.memory_space<vmem>>, %arg2: memref<3x8x1xf32, #tpu.memory_space<vmem>>, %arg3: memref<3x8x1xf32, #tpu.memory_space<vmem>>, %arg4: memref<2x3x8x128xf32, #tpu.memory_space<vmem>>) attributes {dimension_semantics = [#tpu.dimension_semantics<parallel>], iteration_bounds = array<i64: 1>, scalar_prefetch = 0 : i64, scratch_operands = 0 : i64, tpu.core_type = #tpu.core_type<tc>, window_params = [{transform_indices = @transform_0, window_bounds = array<i64: 3, 2, 8, 128>}, {transform_indices = @transform_1, window_bounds = array<i64: 3, 8, 1>}, {transform_indices = @transform_2, window_bounds = array<i64: 3, 8, 1>}, {transform_indices = @transform_3, window_bounds = array<i64: 2, 3, 8, 128>}]} {
    %c0 = arith.constant 0 : index
    %c0_0 = arith.constant 0 : index
    %c0_1 = arith.constant 0 : index
    %c0_2 = arith.constant 0 : index
    %0 = vector.load %arg1[%c0, %c0_0, %c0_1, %c0_2] : memref<3x2x8x128xf32, #tpu.memory_space<vmem>>, vector<1x2x8x128xf32>
    %1 = vector.shape_cast %0 : vector<1x2x8x128xf32> to vector<2x8x128xf32>
    %c1 = arith.constant 1 : index
    %c0_3 = arith.constant 0 : index
    %c0_4 = arith.constant 0 : index
    %c0_5 = arith.constant 0 : index
    %2 = vector.load %arg1[%c1, %c0_3, %c0_4, %c0_5] : memref<3x2x8x128xf32, #tpu.memory_space<vmem>>, vector<1x2x8x128xf32>
    %3 = vector.shape_cast %2 : vector<1x2x8x128xf32> to vector<2x8x128xf32>
    %4 = arith.addf %1, %3 : vector<2x8x128xf32>
    %5 = arith.maximumf %1, %3 : vector<2x8x128xf32>
    %6 = arith.minimumf %1, %3 : vector<2x8x128xf32>
    %c2 = arith.constant 2 : index
    %c0_6 = arith.constant 0 : index
    %c0_7 = arith.constant 0 : index
    %c0_8 = arith.constant 0 : index
    %7 = vector.load %arg1[%c2, %c0_6, %c0_7, %c0_8] : memref<3x2x8x128xf32, #tpu.memory_space<vmem>>, vector<1x2x8x128xf32>
    %8 = vector.shape_cast %7 : vector<1x2x8x128xf32> to vector<2x8x128xf32>
    %9 = arith.addf %4, %8 : vector<2x8x128xf32>
    %10 = arith.maximumf %5, %8 : vector<2x8x128xf32>
    %11 = arith.minimumf %6, %8 : vector<2x8x128xf32>
    %cst = arith.constant 0.333333343 : f32
    %12 = vector.broadcast %cst : f32 to vector<2x8x128xf32>
    %13 = arith.mulf %9, %12 : vector<2x8x128xf32>
    %cst_9 = arith.constant dense<0.000000e+00> : vector<8xf32>
    %14 = vector.multi_reduction <add>, %13, %cst_9 [0, 2] : vector<2x8x128xf32> to vector<8xf32>
    %15 = vector.shape_cast %14 : vector<8xf32> to vector<1x8x1xf32>
    %16 = arith.mulf %13, %13 : vector<2x8x128xf32>
    %cst_10 = arith.constant dense<0.000000e+00> : vector<8xf32>
    %17 = vector.multi_reduction <add>, %16, %cst_10 [0, 2] : vector<2x8x128xf32> to vector<8xf32>
    %18 = vector.shape_cast %17 : vector<8xf32> to vector<1x8x1xf32>
    %cst_11 = arith.constant 3.906250e-03 : f32
    %19 = vector.broadcast %cst_11 : f32 to vector<1x8x1xf32>
    %20 = arith.mulf %15, %19 : vector<1x8x1xf32>
    %cst_12 = arith.constant 3.906250e-03 : f32
    %21 = vector.broadcast %cst_12 : f32 to vector<1x8x1xf32>
    %22 = arith.mulf %18, %21 : vector<1x8x1xf32>
    %23 = arith.mulf %20, %20 : vector<1x8x1xf32>
    %24 = arith.subf %22, %23 : vector<1x8x1xf32>
    %c0_13 = arith.constant 0 : index
    %c0_14 = arith.constant 0 : index
    %c0_15 = arith.constant 0 : index
    %25 = vector.load %arg2[%c0_13, %c0_14, %c0_15] : memref<3x8x1xf32, #tpu.memory_space<vmem>>, vector<1x8x1xf32>
    %26 = vector.shape_cast %25 : vector<1x8x1xf32> to vector<8x1xf32>
    %27 = vector.shape_cast %26 : vector<8x1xf32> to vector<1x8x1xf32>
    %c0_16 = arith.constant 0 : index
    %c0_17 = arith.constant 0 : index
    %c0_18 = arith.constant 0 : index
    %28 = vector.load %arg3[%c0_16, %c0_17, %c0_18] : memref<3x8x1xf32, #tpu.memory_space<vmem>>, vector<1x8x1xf32>
    %29 = vector.shape_cast %28 : vector<1x8x1xf32> to vector<8x1xf32>
    %30 = vector.shape_cast %29 : vector<8x1xf32> to vector<1x8x1xf32>
    %cst_19 = arith.constant 9.99999974E-6 : f32
    %31 = vector.broadcast %cst_19 : f32 to vector<1x8x1xf32>
    %32 = arith.addf %24, %31 : vector<1x8x1xf32>
    %33 = math.rsqrt %32 : vector<1x8x1xf32>
    %34 = arith.mulf %27, %33 : vector<1x8x1xf32>
    %35 = arith.mulf %20, %34 : vector<1x8x1xf32>
    %36 = arith.subf %30, %35 : vector<1x8x1xf32>
    %37 = vector.broadcast %34 : vector<1x8x1xf32> to vector<2x8x128xf32>
    %38 = arith.mulf %13, %37 : vector<2x8x128xf32>
    %39 = vector.broadcast %36 : vector<1x8x1xf32> to vector<2x8x128xf32>
    %40 = arith.addf %38, %39 : vector<2x8x128xf32>
    %c0_20 = arith.constant 0 : index
    %c0_21 = arith.constant 0 : index
    %c0_22 = arith.constant 0 : index
    %c0_23 = arith.constant 0 : index
    %41 = vector.load %arg4[%c0_20, %c0_21, %c0_22, %c0_23] : memref<2x3x8x128xf32, #tpu.memory_space<vmem>>, vector<2x1x8x128xf32>
    %42 = vector.shape_cast %41 : vector<2x1x8x128xf32> to vector<2x8x128xf32>
    %43 = vector.shape_cast %40 : vector<2x8x128xf32> to vector<2x1x8x128xf32>
    tpu.vector_store %arg4[%c0_20, %c0_21, %c0_22, %c0_23], %43 {strides = array<i32>} : memref<2x3x8x128xf32, #tpu.memory_space<vmem>>, vector<2x1x8x128xf32>,
    %cst_24 = arith.constant dense<0.000000e+00> : vector<8xf32>
    %44 = vector.multi_reduction <add>, %10, %cst_24 [0, 2] : vector<2x8x128xf32> to vector<8xf32>
    %45 = vector.shape_cast %44 : vector<8xf32> to vector<1x8x1xf32>
    %46 = arith.mulf %10, %10 : vector<2x8x128xf32>
    %cst_25 = arith.constant dense<0.000000e+00> : vector<8xf32>
    %47 = vector.multi_reduction <add>, %46, %cst_25 [0, 2] : vector<2x8x128xf32> to vector<8xf32>
    %48 = vector.shape_cast %47 : vector<8xf32> to vector<1x8x1xf32>
    %cst_26 = arith.constant 3.906250e-03 : f32
    %49 = vector.broadcast %cst_26 : f32 to vector<1x8x1xf32>
    %50 = arith.mulf %45, %49 : vector<1x8x1xf32>
    %cst_27 = arith.constant 3.906250e-03 : f32
    %51 = vector.broadcast %cst_27 : f32 to vector<1x8x1xf32>
    %52 = arith.mulf %48, %51 : vector<1x8x1xf32>
    %53 = arith.mulf %50, %50 : vector<1x8x1xf32>
    %54 = arith.subf %52, %53 : vector<1x8x1xf32>
    %c1_28 = arith.constant 1 : index
    %c0_29 = arith.constant 0 : index
    %c0_30 = arith.constant 0 : index
    %55 = vector.load %arg2[%c1_28, %c0_29, %c0_30] : memref<3x8x1xf32, #tpu.memory_space<vmem>>, vector<1x8x1xf32>
    %56 = vector.shape_cast %55 : vector<1x8x1xf32> to vector<8x1xf32>
    %57 = vector.shape_cast %56 : vector<8x1xf32> to vector<1x8x1xf32>
    %c1_31 = arith.constant 1 : index
    %c0_32 = arith.constant 0 : index
    %c0_33 = arith.constant 0 : index
    %58 = vector.load %arg3[%c1_31, %c0_32, %c0_33] : memref<3x8x1xf32, #tpu.memory_space<vmem>>, vector<1x8x1xf32>
    %59 = vector.shape_cast %58 : vector<1x8x1xf32> to vector<8x1xf32>
    %60 = vector.shape_cast %59 : vector<8x1xf32> to vector<1x8x1xf32>
    %cst_34 = arith.constant 9.99999974E-6 : f32
    %61 = vector.broadcast %cst_34 : f32 to vector<1x8x1xf32>
    %62 = arith.addf %54, %61 : vector<1x8x1xf32>
    %63 = math.rsqrt %62 : vector<1x8x1xf32>
    %64 = arith.mulf %57, %63 : vector<1x8x1xf32>
    %65 = arith.mulf %50, %64 : vector<1x8x1xf32>
    %66 = arith.subf %60, %65 : vector<1x8x1xf32>
    %67 = vector.broadcast %64 : vector<1x8x1xf32> to vector<2x8x128xf32>
    %68 = arith.mulf %10, %67 : vector<2x8x128xf32>
    %69 = vector.broadcast %66 : vector<1x8x1xf32> to vector<2x8x128xf32>
    %70 = arith.addf %68, %69 : vector<2x8x128xf32>
    %c0_35 = arith.constant 0 : index
    %c1_36 = arith.constant 1 : index
    %c0_37 = arith.constant 0 : index
    %c0_38 = arith.constant 0 : index
    %71 = vector.load %arg4[%c0_35, %c1_36, %c0_37, %c0_38] : memref<2x3x8x128xf32, #tpu.memory_space<vmem>>, vector<2x1x8x128xf32>
    %72 = vector.shape_cast %71 : vector<2x1x8x128xf32> to vector<2x8x128xf32>
    %73 = vector.shape_cast %70 : vector<2x8x128xf32> to vector<2x1x8x128xf32>
    tpu.vector_store %arg4[%c0_35, %c1_36, %c0_37, %c0_38], %73 {strides = array<i32>} : memref<2x3x8x128xf32, #tpu.memory_space<vmem>>, vector<2x1x8x128xf32>,
    %cst_39 = arith.constant dense<0.000000e+00> : vector<8xf32>
    %74 = vector.multi_reduction <add>, %11, %cst_39 [0, 2] : vector<2x8x128xf32> to vector<8xf32>
    %75 = vector.shape_cast %74 : vector<8xf32> to vector<1x8x1xf32>
    %76 = arith.mulf %11, %11 : vector<2x8x128xf32>
    %cst_40 = arith.constant dense<0.000000e+00> : vector<8xf32>
    %77 = vector.multi_reduction <add>, %76, %cst_40 [0, 2] : vector<2x8x128xf32> to vector<8xf32>
    %78 = vector.shape_cast %77 : vector<8xf32> to vector<1x8x1xf32>
    %cst_41 = arith.constant 3.906250e-03 : f32
    %79 = vector.broadcast %cst_41 : f32 to vector<1x8x1xf32>
    %80 = arith.mulf %75, %79 : vector<1x8x1xf32>
    %cst_42 = arith.constant 3.906250e-03 : f32
    %81 = vector.broadcast %cst_42 : f32 to vector<1x8x1xf32>
    %82 = arith.mulf %78, %81 : vector<1x8x1xf32>
    %83 = arith.mulf %80, %80 : vector<1x8x1xf32>
    %84 = arith.subf %82, %83 : vector<1x8x1xf32>
    %c2_43 = arith.constant 2 : index
    %c0_44 = arith.constant 0 : index
    %c0_45 = arith.constant 0 : index
    %85 = vector.load %arg2[%c2_43, %c0_44, %c0_45] : memref<3x8x1xf32, #tpu.memory_space<vmem>>, vector<1x8x1xf32>
    %86 = vector.shape_cast %85 : vector<1x8x1xf32> to vector<8x1xf32>
    %87 = vector.shape_cast %86 : vector<8x1xf32> to vector<1x8x1xf32>
    %c2_46 = arith.constant 2 : index
    %c0_47 = arith.constant 0 : index
    %c0_48 = arith.constant 0 : index
    %88 = vector.load %arg3[%c2_46, %c0_47, %c0_48] : memref<3x8x1xf32, #tpu.memory_space<vmem>>, vector<1x8x1xf32>
    %89 = vector.shape_cast %88 : vector<1x8x1xf32> to vector<8x1xf32>
    %90 = vector.shape_cast %89 : vector<8x1xf32> to vector<1x8x1xf32>
    %cst_49 = arith.constant 9.99999974E-6 : f32
    %91 = vector.broadcast %cst_49 : f32 to vector<1x8x1xf32>
    %92 = arith.addf %84, %91 : vector<1x8x1xf32>
    %93 = math.rsqrt %92 : vector<1x8x1xf32>
    %94 = arith.mulf %87, %93 : vector<1x8x1xf32>
    %95 = arith.mulf %80, %94 : vector<1x8x1xf32>
    %96 = arith.subf %90, %95 : vector<1x8x1xf32>
    %97 = vector.broadcast %94 : vector<1x8x1xf32> to vector<2x8x128xf32>
    %98 = arith.mulf %11, %97 : vector<2x8x128xf32>
    %99 = vector.broadcast %96 : vector<1x8x1xf32> to vector<2x8x128xf32>
    %100 = arith.addf %98, %99 : vector<2x8x128xf32>
    %c0_50 = arith.constant 0 : index
    %c2_51 = arith.constant 2 : index
    %c0_52 = arith.constant 0 : index
    %c0_53 = arith.constant 0 : index
    %101 = vector.load %arg4[%c0_50, %c2_51, %c0_52, %c0_53] : memref<2x3x8x128xf32, #tpu.memory_space<vmem>>, vector<2x1x8x128xf32>
    %102 = vector.shape_cast %101 : vector<2x1x8x128xf32> to vector<2x8x128xf32>
    %103 = vector.shape_cast %100 : vector<2x8x128xf32> to vector<2x1x8x128xf32>
    tpu.vector_store %arg4[%c0_50, %c2_51, %c0_52, %c0_53], %103 {strides = array<i32>} : memref<2x3x8x128xf32, #tpu.memory_space<vmem>>, vector<2x1x8x128xf32>,
    return
  }
  func.func @transform_0(%arg0: i32) -> (i32, i32, i32, i32) {
    %c0_i32 = arith.constant 0 : i32
    %c0_i32_0 = arith.constant 0 : i32
    %c0_i32_1 = arith.constant 0 : i32
    %c0_i32_2 = arith.constant 0 : i32
    return %c0_i32, %c0_i32_0, %arg0, %c0_i32_1 : i32, i32, i32, i32
  }
  func.func @transform_1(%arg0: i32) -> (i32, i32, i32) {
    %c0_i32 = arith.constant 0 : i32
    %c0_i32_0 = arith.constant 0 : i32
    %c0_i32_1 = arith.constant 0 : i32
    return %c0_i32, %arg0, %c0_i32_0 : i32, i32, i32
  }
  func.func @transform_2(%arg0: i32) -> (i32, i32, i32) {
    %c0_i32 = arith.constant 0 : i32
    %c0_i32_0 = arith.constant 0 : i32
    %c0_i32_1 = arith.constant 0 : i32
    return %c0_i32, %arg0, %c0_i32_0 : i32, i32, i32
  }
  func.func @transform_3(%arg0: i32) -> (i32, i32, i32, i32) {
    %c0_i32 = arith.constant 0 : i32
    %c0_i32_0 = arith.constant 0 : i32
    %c0_i32_1 = arith.constant 0 : i32
    %c0_i32_2 = arith.constant 0 : i32
    return %c0_i32, %c0_i32_0, %arg0, %c0_i32_1 : i32, i32, i32, i32
  }
}

</mosaic_0001>

<bundles_post_ra>
// kernel: tpu_custom_call.1
= control target key start
LH: loop header
LB: loop body
LE: loop exit
PB: predicated region body
PF: predicated region fallthrough
CT: control target
= control target key end

     0   :  { %s316_s0 = inlined_call_operand.vmem [shape: f32[3,2,8,128], index: 0, kind: input, shape index: {}]   ;;  %s317_s1 = inlined_call_operand.vmem [shape: f32[3,8,1], index: 1, kind: input, shape index: {}]   ;;  %s318_s2 = inlined_call_operand.vmem [shape: f32[3,8,1], index: 2, kind: input, shape index: {}]   ;;  %s319_s3 = inlined_call_operand.hbm [shape: f32[2,3,8,128], index: 3, kind: output, shape index: {}]  }
   0x1   :  { %v15_v0 = vld [vmem:[%s316_s0] sm:$0xff]  ;;  %v16_v1 = vld [vmem:[%s316_s0 + $0x8] sm:$0xff]  ;;  %v164_v2 = vld [vmem:[%s316_s0 + $0x10] sm:$0xff] }
   0x2   :  { %v165_v3 = vld [vmem:[%s316_s0 + $0x18] sm:$0xff]  ;;  %v24_v4 = vmin.f32 %v15_v0, %v164_v2  ;;  %v166_v5 = vld [vmem:[%s316_s0 + $0x20] sm:$0xff]  ;;  %v167_v6 = vld [vmem:[%s316_s0 + $0x28] sm:$0xff]  ;;  %v22_v7 = vmax.f32 %v15_v0, %v164_v2  ;;  %v20_v8 = vadd.f32 %v164_v2, %v15_v0 }
   0x3   :  { %v25_v9 = vmin.f32 %v16_v1, %v165_v3  ;;  %v23_v10 = vmax.f32 %v16_v1, %v165_v3  ;;  %v21_v11 = vadd.f32 %v165_v3, %v16_v1 }
   0x4   :  { %8 = vsyncpa [#allocation3], 0  ;;  %v250_v12 = vmin.f32 %v24_v4, %v166_v5  ;;  %v252_v13 = vmax.f32 %v22_v7, %v166_v5  ;;  %v29_v14 = vadd.f32 %v166_v5, %v20_v8  ;;  %v208_v32 = vmov 0   ;;  %v49_v54 = vld [vmem:[%s317_s1] sm:$0xff]  ;;  %v168_v57 = vld [vmem:[%s317_s1 + $0x8] sm:$0xff] }
   0x5   :  { %v254_v15 = vmin.f32 %v25_v9, %v167_v6  ;;  %v256_v16 = vmax.f32 %v23_v10, %v167_v6  ;;  %v30_v17 = vadd.f32 %v167_v6, %v21_v11  ;;  %176 = vset.pattern.permute.xlu0 %v208_v32  ;;  %177 = vset.pattern.permute.xlu1 %v208_v32  ;;  %v170_v61 = vld [vmem:[%s317_s1 + $0x10] sm:$0xff]  ;;  %v169_v0 = vld [vmem:[%s318_s2 + $0x8] sm:$0xff]  ;;  %v50_v3 = vld [vmem:[%s318_s2] sm:$0xff]  ;;  %s209_s1 = smov [#allocation2]  }
   0x6   :  { %v258_v18 = vmul.f32 0.33333334, %v29_v14  ;;  %v113_v23 = vmul.f32 %v250_v12, %v250_v12  ;;  %v75_v25 = vmul.f32 %v252_v13, %v252_v13  ;;  %v171_v6 = vld [vmem:[%s318_s2 + $0x10] sm:$0xff]  ;;  %s153_s2 = sshll.u32 %s209_s1, 4  ;;  %s154_s2 = int_to_ptr.vmem [resolvable:$true] %s153_s2 }
   0x7   :  { %v110_v19 = vadd.f32 %v254_v15, %v250_v12  ;;  %v72_v20 = vadd.f32 %v256_v16, %v252_v13  ;;  %v264_v21 = vmul.f32 0.33333334, %v30_v17  ;;  %v114_v24 = vmul.f32 %v254_v15, %v254_v15  ;;  %s184_s8 = scalar_lea.vmem %s154_s2, 768  ;;  %p189_p1 = scmp.lt.s32.totalorder %s154_s2, %s154_s2 }
   0x8   :  { %v40_v22 = vmul.f32 %v258_v18, %v258_v18  ;;  %v76_v28 = vmul.f32 %v256_v16, %v256_v16  ;;  %p185_p0 = scmp.ne.s32.totalorder %s154_s2, %s184_s8  ;;  %p190_p2 = scmp.lt.s32.totalorder %s184_s8, %s184_s8 }
   0x9   :  { %111 = vadd.xlane.f32.xlu1 %v110_v19  ;;  %73 = vadd.xlane.f32.xlu0 %v72_v20  ;;  %v41_v26 = vmul.f32 %v264_v21, %v264_v21  ;;  %v37_v27 = vadd.f32 %v264_v21, %v258_v18  ;;  %v115_v30 = vadd.f32 %v114_v24, %v113_v23 }
   0xa   :  { %v77_v31 = vadd.f32 %v76_v28, %v75_v25  ;;  %p191_p3 = por %p190_p2, %p189_p1 }
   0xb   :  { %v42_v29 = vadd.f32 %v41_v26, %v40_v22 }
   0xc   :  { %p192_p4 = pnand %p191_p3, %p185_p0 }
   0xd   :  { %43 = vadd.xlane.f32.xlu1 %v42_v29  ;;  %38 = vadd.xlane.f32.xlu0 %v37_v27 }
  0x11   :  { %116 = vadd.xlane.f32.xlu1 %v115_v30  ;;  %78 = vadd.xlane.f32.xlu0 %v77_v31 }
  0x96   :  { %v112_v33 = vpop.xlane.xlu1 %111  ;;  %v74_v34 = vpop.xlane.xlu0 %73 }
  0x97   :  { %v118_v35 = vmul.f32 0.00390625, %v112_v33  ;;  %v80_v38 = vmul.f32 0.00390625, %v74_v34 }
  0x99   :  { %v120_v42 = vmul.f32 %v118_v35, %v118_v35  ;;  %v82_v45 = vmul.f32 %v80_v38, %v80_v38 }
  0x9a   :  { %v44_v36 = vpop.xlane.xlu1 %43  ;;  %v39_v37 = vpop.xlane.xlu0 %38 }
  0x9b   :  { %v46_v39 = vmul.f32 0.00390625, %v44_v36  ;;  %v45_v40 = vmul.f32 0.00390625, %v39_v37 }
  0x9d   :  { %v47_v41 = vmul.f32 %v45_v40, %v45_v40 }
  0x9e   :  { %v117_v43 = vpop.xlane.xlu1 %116  ;;  %v79_v44 = vpop.xlane.xlu0 %78 }
  0x9f   :  { %v48_v46 = vsub.f32 %v46_v39, %v47_v41  ;;  %v119_v47 = vmul.f32 0.00390625, %v117_v43  ;;  %v81_v48 = vmul.f32 0.00390625, %v79_v44 }
  0xa1   :  { %v51_v49 = vadd.f32 1e-05, %v48_v46  ;;  %v121_v50 = vsub.f32 %v119_v47, %v120_v42  ;;  %v83_v51 = vsub.f32 %v81_v48, %v82_v45 }
  0xa3   :  { %178 = vrsqrt.f32 %v51_v49  ;;  %v88_v52 = vadd.f32 1e-05, %v83_v51  ;;  %v126_v53 = vadd.f32 1e-05, %v121_v50 }
  0xa5   :  { %180 = vrsqrt.f32 %v88_v52 }
  0xa6   :  { %182 = vrsqrt.f32 %v126_v53 }
  0xad   :  { %v179_v55 = vpop.eup %178 }
  0xae   :  { %v53_v56 = vmul.f32 %v179_v55, %v49_v54 }
  0xaf   :  { %v181_v58 = vpop.eup %180 }
  0xb0   :  { %58 = vperm.xlu0 %176, %v53_v56   ;;  %v90_v59 = vmul.f32 %v181_v58, %v168_v57  ;;  %v183_v60 = vpop.eup %182  ;;  %v54_v1 = vmul.f32 %v53_v56, %v45_v40 }
  0xb1   :  { %v128_v62 = vmul.f32 %v183_v60, %v170_v61 }
  0xb2   :  { %95 = vperm.xlu1 %177, %v90_v59   ;;  %v91_v63 = vmul.f32 %v90_v59, %v80_v38  ;;  %v55_v4 = vsub.f32 %v50_v3, %v54_v1 }
  0xb3   :  { %v129_v5 = vmul.f32 %v128_v62, %v118_v35 }
  0xb4   :  { %v92_v2 = vsub.f32 %v169_v0, %v91_v63 }
  0xb5   :  { %v130_v7 = vsub.f32 %v171_v6, %v129_v5 }
  0xb6   :  { %133 = vperm.xlu1 %177, %v128_v62  }
  0xba   :  { %102 = vperm.xlu1 %177, %v92_v2  }
  0xbe   :  { %65 = vperm.xlu1 %177, %v55_v4  }
  0xc2   :  { %140 = vperm.xlu1 %177, %v130_v7  }
 0x12f   :  { %v59_v14 = vpop.permute.xlu0 %58 }
 0x130   :  { %v61_v22 = vmul.f32 %v59_v14, %v258_v18  ;;  %v62_v23 = vmul.f32 %v59_v14, %v264_v21 }
 0x131   :  { %v96_v8 = vpop.permute.xlu1 %95 }
 0x132   :  { %v98_v10 = vmul.f32 %v96_v8, %v252_v13  ;;  %v99_v11 = vmul.f32 %v96_v8, %v256_v16 }
 0x135   :  { %v134_v9 = vpop.permute.xlu1 %133 }
 0x136   :  { %v136_v27 = vmul.f32 %v134_v9, %v250_v12  ;;  %v137_v13 = vmul.f32 %v134_v9, %v254_v15 }
 0x139   :  { %v103_v17 = vpop.permute.xlu1 %102 }
 0x13a   :  { %v105_v19 = vadd.f32 %v103_v17, %v98_v10  ;;  %v106_v20 = vadd.f32 %v103_v17, %v99_v11 }
 0x13c   :  { %108 = vst [vmem:[#allocation2 + $0x8] sm:$0xff] %v105_v19  ;;  %109 = vst [vmem:[#allocation2 + $0x20] sm:$0xff] %v106_v20 }
 0x13d   :  { %v66_v24 = vpop.permute.xlu1 %65 }
 0x13e   :  { %v68_v25 = vadd.f32 %v66_v24, %v61_v22  ;;  %v69_v26 = vadd.f32 %v66_v24, %v62_v23 }
 0x140   :  { %70 = vst [vmem:[#allocation2] sm:$0xff] %v68_v25  ;;  %71 = vst [vmem:[#allocation2 + $0x18] sm:$0xff] %v69_v26 }
 0x141   :  { %v141_v16 = vpop.permute.xlu1 %140 }
 0x142   :  { %v143_v28 = vadd.f32 %v141_v16, %v136_v27  ;;  %v144_v29 = vadd.f32 %v141_v16, %v137_v13 }
 0x144   :  { %146 = vst [vmem:[#allocation2 + $0x10] sm:$0xff] %v143_v28  ;;  %147 = vst [vmem:[#allocation2 + $0x28] sm:$0xff] %v144_v29 }
 0x145   :  { %195 = shalt.err (!%p192_p4)
}
 0x146   :  { %s196_s11 = scalar_lea.hbm %s319_s3, 768 }
 0x147   :  { %p197_p5 = scmp.ne.s32.totalorder %s319_s3, %s196_s11  ;;  %p200_p6 = scmp.lt.u32.totalorder %s196_s11, %s319_s3 }
 0x149   :  { %p202_p7 = pnand %p200_p6, %p197_p5 }
 0x14b   :  { %205 = shalt.err (!%p202_p7)
}
 0x14c   :  { %s210_s16 = smov 128   ;;  %s211_s17 = smov 8  }
 0x14d   :  { %159 = dma.vmem_to_hbm [thread:$0]  %s154_s2, 768, %s319_s3, [#allocation3], %s210_s16, %s210_s16, %s211_s17  }
 0x14e   :  { %206 = dma.done.wait [#allocation3], 768  }
 0x14f   :  { %207 = vsyncadd [#allocation3], 4294966528 }
 0x150   :  { %163 = vsyncpa [#allocation3], 1 }

</bundles_post_ra>
